<compile_context>
chip_gen: v7x
topology: tpu7x:2x2x1
jax: 0.10.0
libtpu: 0.0.40
codegen_flags: <defaults>
</compile_context>

<pallas_src>
import jax
import jax.numpy as jnp
from jax.experimental import pallas as pl
from jax.experimental.pallas import tpu as pltpu

ATTRIB_ROWS = 2645
ATTRIB_COLS = 4


def _attrib_dma_kernel(attrib_hbm_ref, out_hbm_ref, dma_sem):
    # Forward pass: return the parameter as-is.
    # Single direct HBM->HBM DMA of the whole parameter; no VMEM staging,
    # no vector load/store work.
    cp = pltpu.make_async_copy(attrib_hbm_ref, out_hbm_ref, dma_sem)
    cp.start()
    cp.wait()


def attrib_forward(x, attrib):
    """Equivalent of Attrib.forward(x): returns `attrib`, ignoring `x`.

    `x` is accepted for API parity but not used (exactly as in the PyTorch
    module).  The parameter is materialized via one contiguous HBM->HBM DMA
    issued from a grid-less Pallas kernel.
    """
    del x  # unused, by design of the reference module
    n, c = attrib.shape
    itemsize = jnp.dtype(attrib.dtype).itemsize

    return pl.pallas_call(
        _attrib_dma_kernel,
        out_shape=jax.ShapeDtypeStruct((n, c), attrib.dtype),
        # Raw HBM refs on both sides: the kernel drives the copy itself with
        # a single DMA.  No grid, no VMEM blocks, no pipelining.
        in_specs=[pl.BlockSpec(memory_space=pl.ANY)],
        out_specs=pl.BlockSpec(memory_space=pl.ANY),
        scratch_shapes=[pltpu.SemaphoreType.DMA(())],
        cost_estimate=pl.CostEstimate(
            flops=0,
            transcendentals=0,
            bytes_accessed=2 * n * c * itemsize,
        ),
    )(attrib)


if __name__ == "__main__":
    key = jax.random.PRNGKey(0)
    k_x, k_attr = jax.random.split(key)

    # Small example input (ignored by the forward pass, as in the PyTorch module).
    x = jax.random.normal(k_x, (2, 4, 16, 16), dtype=jnp.float32)

    # 1) Validate with a random, non-zero parameter (catches wrong-buffer /
    #    zero-write bugs that an all-zeros init would hide).
    attrib_rand = jax.random.normal(
        k_attr, (ATTRIB_ROWS, ATTRIB_COLS), dtype=jnp.float32
    )
    out_rand = jax.block_until_ready(attrib_forward(x, attrib_rand))
    assert out_rand.shape == (ATTRIB_ROWS, ATTRIB_COLS)
    assert out_rand.dtype == jnp.float32
    assert bool(jnp.all(out_rand == attrib_rand))

    # 2) Spec-faithful init: nn.Parameter(torch.zeros([2645, 4])).
    attrib_zeros = jnp.zeros((ATTRIB_ROWS, ATTRIB_COLS), dtype=jnp.float32)
    out_zeros = jax.block_until_ready(attrib_forward(x, attrib_zeros))
    assert out_zeros.shape == (ATTRIB_ROWS, ATTRIB_COLS)
    assert bool(jnp.all(out_zeros == attrib_zeros))

    print("KERNEL_OK")
</pallas_src>

<mosaic_0001>
module attributes {stable_mosaic.version = 11 : i64} {
  func.func @_attrib_dma_kernel(%arg0: memref<2645x4xf32, #tpu.memory_space<any>>, %arg1: memref<2645x4xf32, #tpu.memory_space<any>>, %arg2: memref<!tpu.dma_semaphore, #tpu.memory_space<semaphore_mem>>) attributes {dimension_semantics = [], scalar_prefetch = 0 : i64, scratch_operands = 1 : i64, tpu.core_type = #tpu.core_type<tc>} {
    tpu.enqueue_dma source(%arg0 : memref<2645x4xf32, #tpu.memory_space<any>>) target(%arg1 : memref<2645x4xf32, #tpu.memory_space<any>>) target_semaphore(%arg2 : memref<!tpu.dma_semaphore, #tpu.memory_space<semaphore_mem>>)
    tpu.wait_dma2 semaphore(%arg2 : memref<!tpu.dma_semaphore, #tpu.memory_space<semaphore_mem>>) src(%arg0 : memref<2645x4xf32, #tpu.memory_space<any>>) dst(%arg1 : memref<2645x4xf32, #tpu.memory_space<any>>)
    return
  }
}

</mosaic_0001>

<bundles_post_ra>
// kernel: tpu_custom_call.1
= control target key start
LH: loop header
LB: loop body
LE: loop exit
PB: predicated region body
PF: predicated region fallthrough
CT: control target
= control target key end

     0   :  { %s2742_s0 = inlined_call_operand.vmem [shape: f32[2645,4], index: 0, kind: input, shape index: {}]   ;;  %s2743_s1 = inlined_call_operand.vmem [shape: f32[2645,4], index: 1, kind: output, shape index: {}]  }
   0x1   :  { %v43_v0 = vld [vmem:[%s2742_s0] sm:$0xff]  ;;  %v45_v1 = vld [vmem:[%s2742_s0 + $0x8] sm:$0xff]  ;;  %v47_v2 = vld [vmem:[%s2742_s0 + $0x10] sm:$0xff] }
   0x2   :  { %44 = vst [vmem:[%s2743_s1] sm:$0xff] %v43_v0  ;;  %46 = vst [vmem:[%s2743_s1 + $0x8] sm:$0xff] %v45_v1  ;;  %v49_v3 = vld [vmem:[%s2742_s0 + $0x18] sm:$0xff]  ;;  %v51_v4 = vld [vmem:[%s2742_s0 + $0x20] sm:$0xff] }
   0x3   :  { %48 = vst [vmem:[%s2743_s1 + $0x10] sm:$0xff] %v47_v2  ;;  %v53_v5 = vld [vmem:[%s2742_s0 + $0x28] sm:$0xff]  ;;  %50 = vst [vmem:[%s2743_s1 + $0x18] sm:$0xff] %v49_v3  ;;  %v55_v6 = vld [vmem:[%s2742_s0 + $0x30] sm:$0xff] }
   0x4   :  { %52 = vst [vmem:[%s2743_s1 + $0x20] sm:$0xff] %v51_v4  ;;  %54 = vst [vmem:[%s2743_s1 + $0x28] sm:$0xff] %v53_v5  ;;  %v57_v7 = vld [vmem:[%s2742_s0 + $0x38] sm:$0xff]  ;;  %v59_v8 = vld [vmem:[%s2742_s0 + $0x40] sm:$0xff] }
   0x5   :  { %56 = vst [vmem:[%s2743_s1 + $0x30] sm:$0xff] %v55_v6  ;;  %58 = vst [vmem:[%s2743_s1 + $0x38] sm:$0xff] %v57_v7  ;;  %v61_v9 = vld [vmem:[%s2742_s0 + $0x48] sm:$0xff]  ;;  %v63_v10 = vld [vmem:[%s2742_s0 + $0x50] sm:$0xff] }
   0x6   :  { %60 = vst [vmem:[%s2743_s1 + $0x40] sm:$0xff] %v59_v8  ;;  %v65_v11 = vld [vmem:[%s2742_s0 + $0x58] sm:$0xff]  ;;  %62 = vst [vmem:[%s2743_s1 + $0x48] sm:$0xff] %v61_v9  ;;  %v67_v12 = vld [vmem:[%s2742_s0 + $0x60] sm:$0xff] }
   0x7   :  { %64 = vst [vmem:[%s2743_s1 + $0x50] sm:$0xff] %v63_v10  ;;  %66 = vst [vmem:[%s2743_s1 + $0x58] sm:$0xff] %v65_v11  ;;  %v69_v13 = vld [vmem:[%s2742_s0 + $0x68] sm:$0xff]  ;;  %v71_v14 = vld [vmem:[%s2742_s0 + $0x70] sm:$0xff] }
   0x8   :  { %68 = vst [vmem:[%s2743_s1 + $0x60] sm:$0xff] %v67_v12  ;;  %70 = vst [vmem:[%s2743_s1 + $0x68] sm:$0xff] %v69_v13  ;;  %v73_v15 = vld [vmem:[%s2742_s0 + $0x78] sm:$0xff]  ;;  %v75_v16 = vld [vmem:[%s2742_s0 + $0x80] sm:$0xff] }
   0x9   :  { %72 = vst [vmem:[%s2743_s1 + $0x70] sm:$0xff] %v71_v14  ;;  %v77_v17 = vld [vmem:[%s2742_s0 + $0x88] sm:$0xff]  ;;  %74 = vst [vmem:[%s2743_s1 + $0x78] sm:$0xff] %v73_v15  ;;  %v79_v18 = vld [vmem:[%s2742_s0 + $0x90] sm:$0xff] }
   0xa   :  { %76 = vst [vmem:[%s2743_s1 + $0x80] sm:$0xff] %v75_v16  ;;  %78 = vst [vmem:[%s2743_s1 + $0x88] sm:$0xff] %v77_v17  ;;  %v81_v19 = vld [vmem:[%s2742_s0 + $0x98] sm:$0xff]  ;;  %v83_v20 = vld [vmem:[%s2742_s0 + $0xa0] sm:$0xff] }
   0xb   :  { %80 = vst [vmem:[%s2743_s1 + $0x90] sm:$0xff] %v79_v18  ;;  %82 = vst [vmem:[%s2743_s1 + $0x98] sm:$0xff] %v81_v19  ;;  %v85_v21 = vld [vmem:[%s2742_s0 + $0xa8] sm:$0xff]  ;;  %v87_v22 = vld [vmem:[%s2742_s0 + $0xb0] sm:$0xff] }
   0xc   :  { %84 = vst [vmem:[%s2743_s1 + $0xa0] sm:$0xff] %v83_v20  ;;  %v89_v23 = vld [vmem:[%s2742_s0 + $0xb8] sm:$0xff]  ;;  %86 = vst [vmem:[%s2743_s1 + $0xa8] sm:$0xff] %v85_v21  ;;  %v91_v24 = vld [vmem:[%s2742_s0 + $0xc0] sm:$0xff] }
   0xd   :  { %88 = vst [vmem:[%s2743_s1 + $0xb0] sm:$0xff] %v87_v22  ;;  %90 = vst [vmem:[%s2743_s1 + $0xb8] sm:$0xff] %v89_v23  ;;  %v93_v25 = vld [vmem:[%s2742_s0 + $0xc8] sm:$0xff]  ;;  %v95_v26 = vld [vmem:[%s2742_s0 + $0xd0] sm:$0xff] }
   0xe   :  { %92 = vst [vmem:[%s2743_s1 + $0xc0] sm:$0xff] %v91_v24  ;;  %94 = vst [vmem:[%s2743_s1 + $0xc8] sm:$0xff] %v93_v25  ;;  %v97_v27 = vld [vmem:[%s2742_s0 + $0xd8] sm:$0xff]  ;;  %v99_v28 = vld [vmem:[%s2742_s0 + $0xe0] sm:$0xff] }
   0xf   :  { %96 = vst [vmem:[%s2743_s1 + $0xd0] sm:$0xff] %v95_v26  ;;  %v101_v29 = vld [vmem:[%s2742_s0 + $0xe8] sm:$0xff]  ;;  %98 = vst [vmem:[%s2743_s1 + $0xd8] sm:$0xff] %v97_v27  ;;  %v103_v30 = vld [vmem:[%s2742_s0 + $0xf0] sm:$0xff] }
  0x10   :  { %100 = vst [vmem:[%s2743_s1 + $0xe0] sm:$0xff] %v99_v28  ;;  %102 = vst [vmem:[%s2743_s1 + $0xe8] sm:$0xff] %v101_v29  ;;  %v105_v31 = vld [vmem:[%s2742_s0 + $0xf8] sm:$0xff]  ;;  %v107_v32 = vld [vmem:[%s2742_s0 + $0x100] sm:$0xff] }
  0x11   :  { %104 = vst [vmem:[%s2743_s1 + $0xf0] sm:$0xff] %v103_v30  ;;  %106 = vst [vmem:[%s2743_s1 + $0xf8] sm:$0xff] %v105_v31  ;;  %v109_v33 = vld [vmem:[%s2742_s0 + $0x108] sm:$0xff]  ;;  %v111_v34 = vld [vmem:[%s2742_s0 + $0x110] sm:$0xff] }
  0x12   :  { %108 = vst [vmem:[%s2743_s1 + $0x100] sm:$0xff] %v107_v32  ;;  %v113_v35 = vld [vmem:[%s2742_s0 + $0x118] sm:$0xff]  ;;  %110 = vst [vmem:[%s2743_s1 + $0x108] sm:$0xff] %v109_v33  ;;  %v115_v36 = vld [vmem:[%s2742_s0 + $0x120] sm:$0xff] }
  0x13   :  { %112 = vst [vmem:[%s2743_s1 + $0x110] sm:$0xff] %v111_v34  ;;  %114 = vst [vmem:[%s2743_s1 + $0x118] sm:$0xff] %v113_v35  ;;  %v117_v37 = vld [vmem:[%s2742_s0 + $0x128] sm:$0xff]  ;;  %v119_v38 = vld [vmem:[%s2742_s0 + $0x130] sm:$0xff] }
  0x14   :  { %116 = vst [vmem:[%s2743_s1 + $0x120] sm:$0xff] %v115_v36  ;;  %118 = vst [vmem:[%s2743_s1 + $0x128] sm:$0xff] %v117_v37  ;;  %v121_v39 = vld [vmem:[%s2742_s0 + $0x138] sm:$0xff]  ;;  %v123_v40 = vld [vmem:[%s2742_s0 + $0x140] sm:$0xff] }
  0x15   :  { %120 = vst [vmem:[%s2743_s1 + $0x130] sm:$0xff] %v119_v38  ;;  %v125_v41 = vld [vmem:[%s2742_s0 + $0x148] sm:$0xff]  ;;  %122 = vst [vmem:[%s2743_s1 + $0x138] sm:$0xff] %v121_v39  ;;  %v127_v42 = vld [vmem:[%s2742_s0 + $0x150] sm:$0xff] }
  0x16   :  { %124 = vst [vmem:[%s2743_s1 + $0x140] sm:$0xff] %v123_v40  ;;  %126 = vst [vmem:[%s2743_s1 + $0x148] sm:$0xff] %v125_v41  ;;  %v129_v43 = vld [vmem:[%s2742_s0 + $0x158] sm:$0xff]  ;;  %v131_v44 = vld [vmem:[%s2742_s0 + $0x160] sm:$0xff] }
  0x17   :  { %128 = vst [vmem:[%s2743_s1 + $0x150] sm:$0xff] %v127_v42  ;;  %130 = vst [vmem:[%s2743_s1 + $0x158] sm:$0xff] %v129_v43  ;;  %v133_v45 = vld [vmem:[%s2742_s0 + $0x168] sm:$0xff]  ;;  %v135_v46 = vld [vmem:[%s2742_s0 + $0x170] sm:$0xff] }
  0x18   :  { %132 = vst [vmem:[%s2743_s1 + $0x160] sm:$0xff] %v131_v44  ;;  %v137_v47 = vld [vmem:[%s2742_s0 + $0x178] sm:$0xff]  ;;  %134 = vst [vmem:[%s2743_s1 + $0x168] sm:$0xff] %v133_v45  ;;  %v139_v48 = vld [vmem:[%s2742_s0 + $0x180] sm:$0xff] }
  0x19   :  { %136 = vst [vmem:[%s2743_s1 + $0x170] sm:$0xff] %v135_v46  ;;  %138 = vst [vmem:[%s2743_s1 + $0x178] sm:$0xff] %v137_v47  ;;  %v141_v49 = vld [vmem:[%s2742_s0 + $0x188] sm:$0xff]  ;;  %v143_v50 = vld [vmem:[%s2742_s0 + $0x190] sm:$0xff] }
  0x1a   :  { %140 = vst [vmem:[%s2743_s1 + $0x180] sm:$0xff] %v139_v48  ;;  %142 = vst [vmem:[%s2743_s1 + $0x188] sm:$0xff] %v141_v49  ;;  %v145_v51 = vld [vmem:[%s2742_s0 + $0x198] sm:$0xff]  ;;  %v147_v52 = vld [vmem:[%s2742_s0 + $0x1a0] sm:$0xff] }
  0x1b   :  { %144 = vst [vmem:[%s2743_s1 + $0x190] sm:$0xff] %v143_v50  ;;  %v149_v53 = vld [vmem:[%s2742_s0 + $0x1a8] sm:$0xff]  ;;  %146 = vst [vmem:[%s2743_s1 + $0x198] sm:$0xff] %v145_v51  ;;  %v151_v54 = vld [vmem:[%s2742_s0 + $0x1b0] sm:$0xff] }
  0x1c   :  { %148 = vst [vmem:[%s2743_s1 + $0x1a0] sm:$0xff] %v147_v52  ;;  %150 = vst [vmem:[%s2743_s1 + $0x1a8] sm:$0xff] %v149_v53  ;;  %v153_v55 = vld [vmem:[%s2742_s0 + $0x1b8] sm:$0xff]  ;;  %v155_v56 = vld [vmem:[%s2742_s0 + $0x1c0] sm:$0xff] }
  0x1d   :  { %152 = vst [vmem:[%s2743_s1 + $0x1b0] sm:$0xff] %v151_v54  ;;  %154 = vst [vmem:[%s2743_s1 + $0x1b8] sm:$0xff] %v153_v55  ;;  %v157_v57 = vld [vmem:[%s2742_s0 + $0x1c8] sm:$0xff]  ;;  %v159_v58 = vld [vmem:[%s2742_s0 + $0x1d0] sm:$0xff] }
  0x1e   :  { %156 = vst [vmem:[%s2743_s1 + $0x1c0] sm:$0xff] %v155_v56  ;;  %v161_v59 = vld [vmem:[%s2742_s0 + $0x1d8] sm:$0xff]  ;;  %158 = vst [vmem:[%s2743_s1 + $0x1c8] sm:$0xff] %v157_v57  ;;  %v163_v60 = vld [vmem:[%s2742_s0 + $0x1e0] sm:$0xff] }
  0x1f   :  { %160 = vst [vmem:[%s2743_s1 + $0x1d0] sm:$0xff] %v159_v58  ;;  %162 = vst [vmem:[%s2743_s1 + $0x1d8] sm:$0xff] %v161_v59  ;;  %v165_v61 = vld [vmem:[%s2742_s0 + $0x1e8] sm:$0xff]  ;;  %v167_v62 = vld [vmem:[%s2742_s0 + $0x1f0] sm:$0xff] }
  0x20   :  { %164 = vst [vmem:[%s2743_s1 + $0x1e0] sm:$0xff] %v163_v60  ;;  %166 = vst [vmem:[%s2743_s1 + $0x1e8] sm:$0xff] %v165_v61  ;;  %v169_v63 = vld [vmem:[%s2742_s0 + $0x1f8] sm:$0xff]  ;;  %v171_v0 = vld [vmem:[%s2742_s0 + $0x200] sm:$0xff] }
  0x21   :  { %168 = vst [vmem:[%s2743_s1 + $0x1f0] sm:$0xff] %v167_v62  ;;  %v173_v1 = vld [vmem:[%s2742_s0 + $0x208] sm:$0xff]  ;;  %170 = vst [vmem:[%s2743_s1 + $0x1f8] sm:$0xff] %v169_v63  ;;  %v175_v2 = vld [vmem:[%s2742_s0 + $0x210] sm:$0xff] }
  0x22   :  { %172 = vst [vmem:[%s2743_s1 + $0x200] sm:$0xff] %v171_v0  ;;  %174 = vst [vmem:[%s2743_s1 + $0x208] sm:$0xff] %v173_v1  ;;  %v177_v3 = vld [vmem:[%s2742_s0 + $0x218] sm:$0xff]  ;;  %v179_v4 = vld [vmem:[%s2742_s0 + $0x220] sm:$0xff] }
  0x23   :  { %176 = vst [vmem:[%s2743_s1 + $0x210] sm:$0xff] %v175_v2  ;;  %178 = vst [vmem:[%s2743_s1 + $0x218] sm:$0xff] %v177_v3  ;;  %v181_v5 = vld [vmem:[%s2742_s0 + $0x228] sm:$0xff]  ;;  %v183_v6 = vld [vmem:[%s2742_s0 + $0x230] sm:$0xff] }
  0x24   :  { %180 = vst [vmem:[%s2743_s1 + $0x220] sm:$0xff] %v179_v4  ;;  %v185_v7 = vld [vmem:[%s2742_s0 + $0x238] sm:$0xff]  ;;  %182 = vst [vmem:[%s2743_s1 + $0x228] sm:$0xff] %v181_v5  ;;  %v187_v8 = vld [vmem:[%s2742_s0 + $0x240] sm:$0xff] }
  0x25   :  { %184 = vst [vmem:[%s2743_s1 + $0x230] sm:$0xff] %v183_v6  ;;  %186 = vst [vmem:[%s2743_s1 + $0x238] sm:$0xff] %v185_v7  ;;  %v189_v9 = vld [vmem:[%s2742_s0 + $0x248] sm:$0xff]  ;;  %v191_v10 = vld [vmem:[%s2742_s0 + $0x250] sm:$0xff] }
  0x26   :  { %188 = vst [vmem:[%s2743_s1 + $0x240] sm:$0xff] %v187_v8  ;;  %190 = vst [vmem:[%s2743_s1 + $0x248] sm:$0xff] %v189_v9  ;;  %v193_v11 = vld [vmem:[%s2742_s0 + $0x258] sm:$0xff]  ;;  %v195_v12 = vld [vmem:[%s2742_s0 + $0x260] sm:$0xff] }
  0x27   :  { %192 = vst [vmem:[%s2743_s1 + $0x250] sm:$0xff] %v191_v10  ;;  %v197_v13 = vld [vmem:[%s2742_s0 + $0x268] sm:$0xff]  ;;  %194 = vst [vmem:[%s2743_s1 + $0x258] sm:$0xff] %v193_v11  ;;  %v199_v14 = vld [vmem:[%s2742_s0 + $0x270] sm:$0xff] }
  0x28   :  { %196 = vst [vmem:[%s2743_s1 + $0x260] sm:$0xff] %v195_v12  ;;  %198 = vst [vmem:[%s2743_s1 + $0x268] sm:$0xff] %v197_v13  ;;  %v201_v15 = vld [vmem:[%s2742_s0 + $0x278] sm:$0xff]  ;;  %v203_v16 = vld [vmem:[%s2742_s0 + $0x280] sm:$0xff] }
  0x29   :  { %200 = vst [vmem:[%s2743_s1 + $0x270] sm:$0xff] %v199_v14  ;;  %202 = vst [vmem:[%s2743_s1 + $0x278] sm:$0xff] %v201_v15  ;;  %v205_v17 = vld [vmem:[%s2742_s0 + $0x288] sm:$0xff]  ;;  %v207_v18 = vld [vmem:[%s2742_s0 + $0x290] sm:$0xff] }
  0x2a   :  { %204 = vst [vmem:[%s2743_s1 + $0x280] sm:$0xff] %v203_v16  ;;  %v209_v19 = vld [vmem:[%s2742_s0 + $0x298] sm:$0xff]  ;;  %206 = vst [vmem:[%s2743_s1 + $0x288] sm:$0xff] %v205_v17  ;;  %v211_v20 = vld [vmem:[%s2742_s0 + $0x2a0] sm:$0xff] }
  0x2b   :  { %208 = vst [vmem:[%s2743_s1 + $0x290] sm:$0xff] %v207_v18  ;;  %210 = vst [vmem:[%s2743_s1 + $0x298] sm:$0xff] %v209_v19  ;;  %v213_v21 = vld [vmem:[%s2742_s0 + $0x2a8] sm:$0xff]  ;;  %v215_v22 = vld [vmem:[%s2742_s0 + $0x2b0] sm:$0xff] }
  0x2c   :  { %212 = vst [vmem:[%s2743_s1 + $0x2a0] sm:$0xff] %v211_v20  ;;  %214 = vst [vmem:[%s2743_s1 + $0x2a8] sm:$0xff] %v213_v21  ;;  %v217_v23 = vld [vmem:[%s2742_s0 + $0x2b8] sm:$0xff]  ;;  %v219_v24 = vld [vmem:[%s2742_s0 + $0x2c0] sm:$0xff] }
  0x2d   :  { %216 = vst [vmem:[%s2743_s1 + $0x2b0] sm:$0xff] %v215_v22  ;;  %v221_v25 = vld [vmem:[%s2742_s0 + $0x2c8] sm:$0xff]  ;;  %218 = vst [vmem:[%s2743_s1 + $0x2b8] sm:$0xff] %v217_v23  ;;  %v223_v26 = vld [vmem:[%s2742_s0 + $0x2d0] sm:$0xff] }
  0x2e   :  { %220 = vst [vmem:[%s2743_s1 + $0x2c0] sm:$0xff] %v219_v24  ;;  %222 = vst [vmem:[%s2743_s1 + $0x2c8] sm:$0xff] %v221_v25  ;;  %v225_v27 = vld [vmem:[%s2742_s0 + $0x2d8] sm:$0xff]  ;;  %v227_v28 = vld [vmem:[%s2742_s0 + $0x2e0] sm:$0xff] }
  0x2f   :  { %224 = vst [vmem:[%s2743_s1 + $0x2d0] sm:$0xff] %v223_v26  ;;  %226 = vst [vmem:[%s2743_s1 + $0x2d8] sm:$0xff] %v225_v27  ;;  %v229_v29 = vld [vmem:[%s2742_s0 + $0x2e8] sm:$0xff]  ;;  %v231_v30 = vld [vmem:[%s2742_s0 + $0x2f0] sm:$0xff] }
  0x30   :  { %228 = vst [vmem:[%s2743_s1 + $0x2e0] sm:$0xff] %v227_v28  ;;  %v233_v31 = vld [vmem:[%s2742_s0 + $0x2f8] sm:$0xff]  ;;  %230 = vst [vmem:[%s2743_s1 + $0x2e8] sm:$0xff] %v229_v29  ;;  %v235_v32 = vld [vmem:[%s2742_s0 + $0x300] sm:$0xff] }
  0x31   :  { %232 = vst [vmem:[%s2743_s1 + $0x2f0] sm:$0xff] %v231_v30  ;;  %234 = vst [vmem:[%s2743_s1 + $0x2f8] sm:$0xff] %v233_v31  ;;  %v237_v33 = vld [vmem:[%s2742_s0 + $0x308] sm:$0xff]  ;;  %v239_v34 = vld [vmem:[%s2742_s0 + $0x310] sm:$0xff] }
  0x32   :  { %236 = vst [vmem:[%s2743_s1 + $0x300] sm:$0xff] %v235_v32  ;;  %238 = vst [vmem:[%s2743_s1 + $0x308] sm:$0xff] %v237_v33  ;;  %v241_v35 = vld [vmem:[%s2742_s0 + $0x318] sm:$0xff]  ;;  %v243_v36 = vld [vmem:[%s2742_s0 + $0x320] sm:$0xff] }
  0x33   :  { %240 = vst [vmem:[%s2743_s1 + $0x310] sm:$0xff] %v239_v34  ;;  %v245_v37 = vld [vmem:[%s2742_s0 + $0x328] sm:$0xff]  ;;  %242 = vst [vmem:[%s2743_s1 + $0x318] sm:$0xff] %v241_v35  ;;  %v247_v38 = vld [vmem:[%s2742_s0 + $0x330] sm:$0xff] }
  0x34   :  { %244 = vst [vmem:[%s2743_s1 + $0x320] sm:$0xff] %v243_v36  ;;  %246 = vst [vmem:[%s2743_s1 + $0x328] sm:$0xff] %v245_v37  ;;  %v249_v39 = vld [vmem:[%s2742_s0 + $0x338] sm:$0xff]  ;;  %v251_v40 = vld [vmem:[%s2742_s0 + $0x340] sm:$0xff] }
  0x35   :  { %248 = vst [vmem:[%s2743_s1 + $0x330] sm:$0xff] %v247_v38  ;;  %250 = vst [vmem:[%s2743_s1 + $0x338] sm:$0xff] %v249_v39  ;;  %v253_v41 = vld [vmem:[%s2742_s0 + $0x348] sm:$0xff]  ;;  %v255_v42 = vld [vmem:[%s2742_s0 + $0x350] sm:$0xff] }
  0x36   :  { %252 = vst [vmem:[%s2743_s1 + $0x340] sm:$0xff] %v251_v40  ;;  %v257_v43 = vld [vmem:[%s2742_s0 + $0x358] sm:$0xff]  ;;  %254 = vst [vmem:[%s2743_s1 + $0x348] sm:$0xff] %v253_v41  ;;  %v259_v44 = vld [vmem:[%s2742_s0 + $0x360] sm:$0xff] }
  0x37   :  { %256 = vst [vmem:[%s2743_s1 + $0x350] sm:$0xff] %v255_v42  ;;  %258 = vst [vmem:[%s2743_s1 + $0x358] sm:$0xff] %v257_v43  ;;  %v261_v45 = vld [vmem:[%s2742_s0 + $0x368] sm:$0xff]  ;;  %v263_v46 = vld [vmem:[%s2742_s0 + $0x370] sm:$0xff] }
  0x38   :  { %260 = vst [vmem:[%s2743_s1 + $0x360] sm:$0xff] %v259_v44  ;;  %262 = vst [vmem:[%s2743_s1 + $0x368] sm:$0xff] %v261_v45  ;;  %v265_v47 = vld [vmem:[%s2742_s0 + $0x378] sm:$0xff]  ;;  %v267_v48 = vld [vmem:[%s2742_s0 + $0x380] sm:$0xff] }
  0x39   :  { %264 = vst [vmem:[%s2743_s1 + $0x370] sm:$0xff] %v263_v46  ;;  %v269_v49 = vld [vmem:[%s2742_s0 + $0x388] sm:$0xff]  ;;  %266 = vst [vmem:[%s2743_s1 + $0x378] sm:$0xff] %v265_v47  ;;  %v271_v50 = vld [vmem:[%s2742_s0 + $0x390] sm:$0xff] }
  0x3a   :  { %268 = vst [vmem:[%s2743_s1 + $0x380] sm:$0xff] %v267_v48  ;;  %270 = vst [vmem:[%s2743_s1 + $0x388] sm:$0xff] %v269_v49  ;;  %v273_v51 = vld [vmem:[%s2742_s0 + $0x398] sm:$0xff]  ;;  %v275_v52 = vld [vmem:[%s2742_s0 + $0x3a0] sm:$0xff] }
  0x3b   :  { %272 = vst [vmem:[%s2743_s1 + $0x390] sm:$0xff] %v271_v50  ;;  %274 = vst [vmem:[%s2743_s1 + $0x398] sm:$0xff] %v273_v51  ;;  %v277_v53 = vld [vmem:[%s2742_s0 + $0x3a8] sm:$0xff]  ;;  %v279_v54 = vld [vmem:[%s2742_s0 + $0x3b0] sm:$0xff] }
  0x3c   :  { %276 = vst [vmem:[%s2743_s1 + $0x3a0] sm:$0xff] %v275_v52  ;;  %v281_v55 = vld [vmem:[%s2742_s0 + $0x3b8] sm:$0xff]  ;;  %278 = vst [vmem:[%s2743_s1 + $0x3a8] sm:$0xff] %v277_v53  ;;  %v283_v56 = vld [vmem:[%s2742_s0 + $0x3c0] sm:$0xff] }
  0x3d   :  { %280 = vst [vmem:[%s2743_s1 + $0x3b0] sm:$0xff] %v279_v54  ;;  %282 = vst [vmem:[%s2743_s1 + $0x3b8] sm:$0xff] %v281_v55  ;;  %v285_v57 = vld [vmem:[%s2742_s0 + $0x3c8] sm:$0xff]  ;;  %v287_v58 = vld [vmem:[%s2742_s0 + $0x3d0] sm:$0xff] }
  0x3e   :  { %284 = vst [vmem:[%s2743_s1 + $0x3c0] sm:$0xff] %v283_v56  ;;  %286 = vst [vmem:[%s2743_s1 + $0x3c8] sm:$0xff] %v285_v57  ;;  %v289_v59 = vld [vmem:[%s2742_s0 + $0x3d8] sm:$0xff]  ;;  %v291_v60 = vld [vmem:[%s2742_s0 + $0x3e0] sm:$0xff] }
  0x3f   :  { %288 = vst [vmem:[%s2743_s1 + $0x3d0] sm:$0xff] %v287_v58  ;;  %v293_v61 = vld [vmem:[%s2742_s0 + $0x3e8] sm:$0xff]  ;;  %290 = vst [vmem:[%s2743_s1 + $0x3d8] sm:$0xff] %v289_v59  ;;  %v295_v62 = vld [vmem:[%s2742_s0 + $0x3f0] sm:$0xff] }
  0x40   :  { %292 = vst [vmem:[%s2743_s1 + $0x3e0] sm:$0xff] %v291_v60  ;;  %294 = vst [vmem:[%s2743_s1 + $0x3e8] sm:$0xff] %v293_v61  ;;  %v297_v63 = vld [vmem:[%s2742_s0 + $0x3f8] sm:$0xff]  ;;  %v299_v0 = vld [vmem:[%s2742_s0 + $0x400] sm:$0xff] }
  0x41   :  { %296 = vst [vmem:[%s2743_s1 + $0x3f0] sm:$0xff] %v295_v62  ;;  %298 = vst [vmem:[%s2743_s1 + $0x3f8] sm:$0xff] %v297_v63  ;;  %v301_v1 = vld [vmem:[%s2742_s0 + $0x408] sm:$0xff]  ;;  %v303_v2 = vld [vmem:[%s2742_s0 + $0x410] sm:$0xff] }
  0x42   :  { %300 = vst [vmem:[%s2743_s1 + $0x400] sm:$0xff] %v299_v0  ;;  %v305_v3 = vld [vmem:[%s2742_s0 + $0x418] sm:$0xff]  ;;  %302 = vst [vmem:[%s2743_s1 + $0x408] sm:$0xff] %v301_v1  ;;  %v307_v4 = vld [vmem:[%s2742_s0 + $0x420] sm:$0xff] }
  0x43   :  { %304 = vst [vmem:[%s2743_s1 + $0x410] sm:$0xff] %v303_v2  ;;  %306 = vst [vmem:[%s2743_s1 + $0x418] sm:$0xff] %v305_v3  ;;  %v309_v5 = vld [vmem:[%s2742_s0 + $0x428] sm:$0xff]  ;;  %v311_v6 = vld [vmem:[%s2742_s0 + $0x430] sm:$0xff] }
  0x44   :  { %308 = vst [vmem:[%s2743_s1 + $0x420] sm:$0xff] %v307_v4  ;;  %310 = vst [vmem:[%s2743_s1 + $0x428] sm:$0xff] %v309_v5  ;;  %v313_v7 = vld [vmem:[%s2742_s0 + $0x438] sm:$0xff]  ;;  %v315_v8 = vld [vmem:[%s2742_s0 + $0x440] sm:$0xff] }
  0x45   :  { %312 = vst [vmem:[%s2743_s1 + $0x430] sm:$0xff] %v311_v6  ;;  %v317_v9 = vld [vmem:[%s2742_s0 + $0x448] sm:$0xff]  ;;  %314 = vst [vmem:[%s2743_s1 + $0x438] sm:$0xff] %v313_v7  ;;  %v319_v10 = vld [vmem:[%s2742_s0 + $0x450] sm:$0xff] }
  0x46   :  { %316 = vst [vmem:[%s2743_s1 + $0x440] sm:$0xff] %v315_v8  ;;  %318 = vst [vmem:[%s2743_s1 + $0x448] sm:$0xff] %v317_v9  ;;  %v321_v11 = vld [vmem:[%s2742_s0 + $0x458] sm:$0xff]  ;;  %v323_v12 = vld [vmem:[%s2742_s0 + $0x460] sm:$0xff] }
  0x47   :  { %320 = vst [vmem:[%s2743_s1 + $0x450] sm:$0xff] %v319_v10  ;;  %322 = vst [vmem:[%s2743_s1 + $0x458] sm:$0xff] %v321_v11  ;;  %v325_v13 = vld [vmem:[%s2742_s0 + $0x468] sm:$0xff]  ;;  %v327_v14 = vld [vmem:[%s2742_s0 + $0x470] sm:$0xff] }
  0x48   :  { %324 = vst [vmem:[%s2743_s1 + $0x460] sm:$0xff] %v323_v12  ;;  %v329_v15 = vld [vmem:[%s2742_s0 + $0x478] sm:$0xff]  ;;  %326 = vst [vmem:[%s2743_s1 + $0x468] sm:$0xff] %v325_v13  ;;  %v331_v16 = vld [vmem:[%s2742_s0 + $0x480] sm:$0xff] }
  0x49   :  { %328 = vst [vmem:[%s2743_s1 + $0x470] sm:$0xff] %v327_v14  ;;  %330 = vst [vmem:[%s2743_s1 + $0x478] sm:$0xff] %v329_v15  ;;  %v333_v17 = vld [vmem:[%s2742_s0 + $0x488] sm:$0xff]  ;;  %v335_v18 = vld [vmem:[%s2742_s0 + $0x490] sm:$0xff] }
  0x4a   :  { %332 = vst [vmem:[%s2743_s1 + $0x480] sm:$0xff] %v331_v16  ;;  %334 = vst [vmem:[%s2743_s1 + $0x488] sm:$0xff] %v333_v17  ;;  %v337_v19 = vld [vmem:[%s2742_s0 + $0x498] sm:$0xff]  ;;  %v339_v20 = vld [vmem:[%s2742_s0 + $0x4a0] sm:$0xff] }
  0x4b   :  { %336 = vst [vmem:[%s2743_s1 + $0x490] sm:$0xff] %v335_v18  ;;  %v341_v21 = vld [vmem:[%s2742_s0 + $0x4a8] sm:$0xff]  ;;  %338 = vst [vmem:[%s2743_s1 + $0x498] sm:$0xff] %v337_v19  ;;  %v343_v22 = vld [vmem:[%s2742_s0 + $0x4b0] sm:$0xff] }
  0x4c   :  { %340 = vst [vmem:[%s2743_s1 + $0x4a0] sm:$0xff] %v339_v20  ;;  %342 = vst [vmem:[%s2743_s1 + $0x4a8] sm:$0xff] %v341_v21  ;;  %v345_v23 = vld [vmem:[%s2742_s0 + $0x4b8] sm:$0xff]  ;;  %v347_v24 = vld [vmem:[%s2742_s0 + $0x4c0] sm:$0xff] }
  0x4d   :  { %344 = vst [vmem:[%s2743_s1 + $0x4b0] sm:$0xff] %v343_v22  ;;  %346 = vst [vmem:[%s2743_s1 + $0x4b8] sm:$0xff] %v345_v23  ;;  %v349_v25 = vld [vmem:[%s2742_s0 + $0x4c8] sm:$0xff]  ;;  %v351_v26 = vld [vmem:[%s2742_s0 + $0x4d0] sm:$0xff] }
  0x4e   :  { %348 = vst [vmem:[%s2743_s1 + $0x4c0] sm:$0xff] %v347_v24  ;;  %v353_v27 = vld [vmem:[%s2742_s0 + $0x4d8] sm:$0xff]  ;;  %350 = vst [vmem:[%s2743_s1 + $0x4c8] sm:$0xff] %v349_v25  ;;  %v355_v28 = vld [vmem:[%s2742_s0 + $0x4e0] sm:$0xff] }
  0x4f   :  { %352 = vst [vmem:[%s2743_s1 + $0x4d0] sm:$0xff] %v351_v26  ;;  %354 = vst [vmem:[%s2743_s1 + $0x4d8] sm:$0xff] %v353_v27  ;;  %v357_v29 = vld [vmem:[%s2742_s0 + $0x4e8] sm:$0xff]  ;;  %v359_v30 = vld [vmem:[%s2742_s0 + $0x4f0] sm:$0xff] }
  0x50   :  { %356 = vst [vmem:[%s2743_s1 + $0x4e0] sm:$0xff] %v355_v28  ;;  %358 = vst [vmem:[%s2743_s1 + $0x4e8] sm:$0xff] %v357_v29  ;;  %v361_v31 = vld [vmem:[%s2742_s0 + $0x4f8] sm:$0xff]  ;;  %v363_v32 = vld [vmem:[%s2742_s0 + $0x500] sm:$0xff] }
  0x51   :  { %360 = vst [vmem:[%s2743_s1 + $0x4f0] sm:$0xff] %v359_v30  ;;  %v365_v33 = vld [vmem:[%s2742_s0 + $0x508] sm:$0xff]  ;;  %362 = vst [vmem:[%s2743_s1 + $0x4f8] sm:$0xff] %v361_v31  ;;  %v367_v34 = vld [vmem:[%s2742_s0 + $0x510] sm:$0xff] }
  0x52   :  { %364 = vst [vmem:[%s2743_s1 + $0x500] sm:$0xff] %v363_v32  ;;  %366 = vst [vmem:[%s2743_s1 + $0x508] sm:$0xff] %v365_v33  ;;  %v369_v35 = vld [vmem:[%s2742_s0 + $0x518] sm:$0xff]  ;;  %v371_v36 = vld [vmem:[%s2742_s0 + $0x520] sm:$0xff] }
  0x53   :  { %368 = vst [vmem:[%s2743_s1 + $0x510] sm:$0xff] %v367_v34  ;;  %370 = vst [vmem:[%s2743_s1 + $0x518] sm:$0xff] %v369_v35  ;;  %v373_v37 = vld [vmem:[%s2742_s0 + $0x528] sm:$0xff]  ;;  %v375_v38 = vld [vmem:[%s2742_s0 + $0x530] sm:$0xff] }
  0x54   :  { %372 = vst [vmem:[%s2743_s1 + $0x520] sm:$0xff] %v371_v36  ;;  %v377_v39 = vld [vmem:[%s2742_s0 + $0x538] sm:$0xff]  ;;  %374 = vst [vmem:[%s2743_s1 + $0x528] sm:$0xff] %v373_v37  ;;  %v379_v40 = vld [vmem:[%s2742_s0 + $0x540] sm:$0xff] }
  0x55   :  { %376 = vst [vmem:[%s2743_s1 + $0x530] sm:$0xff] %v375_v38  ;;  %378 = vst [vmem:[%s2743_s1 + $0x538] sm:$0xff] %v377_v39  ;;  %v381_v41 = vld [vmem:[%s2742_s0 + $0x548] sm:$0xff]  ;;  %v383_v42 = vld [vmem:[%s2742_s0 + $0x550] sm:$0xff] }
  0x56   :  { %380 = vst [vmem:[%s2743_s1 + $0x540] sm:$0xff] %v379_v40  ;;  %382 = vst [vmem:[%s2743_s1 + $0x548] sm:$0xff] %v381_v41  ;;  %v385_v43 = vld [vmem:[%s2742_s0 + $0x558] sm:$0xff]  ;;  %v387_v44 = vld [vmem:[%s2742_s0 + $0x560] sm:$0xff] }
  0x57   :  { %384 = vst [vmem:[%s2743_s1 + $0x550] sm:$0xff] %v383_v42  ;;  %v389_v45 = vld [vmem:[%s2742_s0 + $0x568] sm:$0xff]  ;;  %386 = vst [vmem:[%s2743_s1 + $0x558] sm:$0xff] %v385_v43  ;;  %v391_v46 = vld [vmem:[%s2742_s0 + $0x570] sm:$0xff] }
  0x58   :  { %388 = vst [vmem:[%s2743_s1 + $0x560] sm:$0xff] %v387_v44  ;;  %390 = vst [vmem:[%s2743_s1 + $0x568] sm:$0xff] %v389_v45  ;;  %v393_v47 = vld [vmem:[%s2742_s0 + $0x578] sm:$0xff]  ;;  %v395_v48 = vld [vmem:[%s2742_s0 + $0x580] sm:$0xff] }
  0x59   :  { %392 = vst [vmem:[%s2743_s1 + $0x570] sm:$0xff] %v391_v46  ;;  %394 = vst [vmem:[%s2743_s1 + $0x578] sm:$0xff] %v393_v47  ;;  %v397_v49 = vld [vmem:[%s2742_s0 + $0x588] sm:$0xff]  ;;  %v399_v50 = vld [vmem:[%s2742_s0 + $0x590] sm:$0xff] }
  0x5a   :  { %396 = vst [vmem:[%s2743_s1 + $0x580] sm:$0xff] %v395_v48  ;;  %v401_v51 = vld [vmem:[%s2742_s0 + $0x598] sm:$0xff]  ;;  %398 = vst [vmem:[%s2743_s1 + $0x588] sm:$0xff] %v397_v49  ;;  %v403_v52 = vld [vmem:[%s2742_s0 + $0x5a0] sm:$0xff] }
  0x5b   :  { %400 = vst [vmem:[%s2743_s1 + $0x590] sm:$0xff] %v399_v50  ;;  %402 = vst [vmem:[%s2743_s1 + $0x598] sm:$0xff] %v401_v51  ;;  %v405_v53 = vld [vmem:[%s2742_s0 + $0x5a8] sm:$0xff]  ;;  %v407_v54 = vld [vmem:[%s2742_s0 + $0x5b0] sm:$0xff] }
  0x5c   :  { %404 = vst [vmem:[%s2743_s1 + $0x5a0] sm:$0xff] %v403_v52  ;;  %406 = vst [vmem:[%s2743_s1 + $0x5a8] sm:$0xff] %v405_v53  ;;  %v409_v55 = vld [vmem:[%s2742_s0 + $0x5b8] sm:$0xff]  ;;  %v411_v56 = vld [vmem:[%s2742_s0 + $0x5c0] sm:$0xff] }
  0x5d   :  { %408 = vst [vmem:[%s2743_s1 + $0x5b0] sm:$0xff] %v407_v54  ;;  %v413_v57 = vld [vmem:[%s2742_s0 + $0x5c8] sm:$0xff]  ;;  %410 = vst [vmem:[%s2743_s1 + $0x5b8] sm:$0xff] %v409_v55  ;;  %v415_v58 = vld [vmem:[%s2742_s0 + $0x5d0] sm:$0xff] }
  0x5e   :  { %412 = vst [vmem:[%s2743_s1 + $0x5c0] sm:$0xff] %v411_v56  ;;  %414 = vst [vmem:[%s2743_s1 + $0x5c8] sm:$0xff] %v413_v57  ;;  %v417_v59 = vld [vmem:[%s2742_s0 + $0x5d8] sm:$0xff]  ;;  %v419_v60 = vld [vmem:[%s2742_s0 + $0x5e0] sm:$0xff] }
  0x5f   :  { %416 = vst [vmem:[%s2743_s1 + $0x5d0] sm:$0xff] %v415_v58  ;;  %418 = vst [vmem:[%s2743_s1 + $0x5d8] sm:$0xff] %v417_v59  ;;  %v421_v61 = vld [vmem:[%s2742_s0 + $0x5e8] sm:$0xff]  ;;  %v423_v62 = vld [vmem:[%s2742_s0 + $0x5f0] sm:$0xff] }
  0x60   :  { %420 = vst [vmem:[%s2743_s1 + $0x5e0] sm:$0xff] %v419_v60  ;;  %v425_v63 = vld [vmem:[%s2742_s0 + $0x5f8] sm:$0xff]  ;;  %422 = vst [vmem:[%s2743_s1 + $0x5e8] sm:$0xff] %v421_v61  ;;  %v427_v0 = vld [vmem:[%s2742_s0 + $0x600] sm:$0xff] }
  0x61   :  { %424 = vst [vmem:[%s2743_s1 + $0x5f0] sm:$0xff] %v423_v62  ;;  %426 = vst [vmem:[%s2743_s1 + $0x5f8] sm:$0xff] %v425_v63  ;;  %v429_v1 = vld [vmem:[%s2742_s0 + $0x608] sm:$0xff]  ;;  %v431_v2 = vld [vmem:[%s2742_s0 + $0x610] sm:$0xff] }
  0x62   :  { %428 = vst [vmem:[%s2743_s1 + $0x600] sm:$0xff] %v427_v0  ;;  %430 = vst [vmem:[%s2743_s1 + $0x608] sm:$0xff] %v429_v1  ;;  %v433_v3 = vld [vmem:[%s2742_s0 + $0x618] sm:$0xff]  ;;  %v435_v4 = vld [vmem:[%s2742_s0 + $0x620] sm:$0xff] }
  0x63   :  { %432 = vst [vmem:[%s2743_s1 + $0x610] sm:$0xff] %v431_v2  ;;  %v437_v5 = vld [vmem:[%s2742_s0 + $0x628] sm:$0xff]  ;;  %434 = vst [vmem:[%s2743_s1 + $0x618] sm:$0xff] %v433_v3  ;;  %v439_v6 = vld [vmem:[%s2742_s0 + $0x630] sm:$0xff] }
  0x64   :  { %436 = vst [vmem:[%s2743_s1 + $0x620] sm:$0xff] %v435_v4  ;;  %438 = vst [vmem:[%s2743_s1 + $0x628] sm:$0xff] %v437_v5  ;;  %v441_v7 = vld [vmem:[%s2742_s0 + $0x638] sm:$0xff]  ;;  %v443_v8 = vld [vmem:[%s2742_s0 + $0x640] sm:$0xff] }
  0x65   :  { %440 = vst [vmem:[%s2743_s1 + $0x630] sm:$0xff] %v439_v6  ;;  %442 = vst [vmem:[%s2743_s1 + $0x638] sm:$0xff] %v441_v7  ;;  %v445_v9 = vld [vmem:[%s2742_s0 + $0x648] sm:$0xff]  ;;  %v447_v10 = vld [vmem:[%s2742_s0 + $0x650] sm:$0xff] }
  0x66   :  { %444 = vst [vmem:[%s2743_s1 + $0x640] sm:$0xff] %v443_v8  ;;  %v449_v11 = vld [vmem:[%s2742_s0 + $0x658] sm:$0xff]  ;;  %446 = vst [vmem:[%s2743_s1 + $0x648] sm:$0xff] %v445_v9  ;;  %v451_v12 = vld [vmem:[%s2742_s0 + $0x660] sm:$0xff] }
  0x67   :  { %448 = vst [vmem:[%s2743_s1 + $0x650] sm:$0xff] %v447_v10  ;;  %450 = vst [vmem:[%s2743_s1 + $0x658] sm:$0xff] %v449_v11  ;;  %v453_v13 = vld [vmem:[%s2742_s0 + $0x668] sm:$0xff]  ;;  %v455_v14 = vld [vmem:[%s2742_s0 + $0x670] sm:$0xff] }
  0x68   :  { %452 = vst [vmem:[%s2743_s1 + $0x660] sm:$0xff] %v451_v12  ;;  %454 = vst [vmem:[%s2743_s1 + $0x668] sm:$0xff] %v453_v13  ;;  %v457_v15 = vld [vmem:[%s2742_s0 + $0x678] sm:$0xff]  ;;  %v459_v16 = vld [vmem:[%s2742_s0 + $0x680] sm:$0xff] }
  0x69   :  { %456 = vst [vmem:[%s2743_s1 + $0x670] sm:$0xff] %v455_v14  ;;  %v461_v17 = vld [vmem:[%s2742_s0 + $0x688] sm:$0xff]  ;;  %458 = vst [vmem:[%s2743_s1 + $0x678] sm:$0xff] %v457_v15  ;;  %v463_v18 = vld [vmem:[%s2742_s0 + $0x690] sm:$0xff] }
  0x6a   :  { %460 = vst [vmem:[%s2743_s1 + $0x680] sm:$0xff] %v459_v16  ;;  %462 = vst [vmem:[%s2743_s1 + $0x688] sm:$0xff] %v461_v17  ;;  %v465_v19 = vld [vmem:[%s2742_s0 + $0x698] sm:$0xff]  ;;  %v467_v20 = vld [vmem:[%s2742_s0 + $0x6a0] sm:$0xff] }
  0x6b   :  { %464 = vst [vmem:[%s2743_s1 + $0x690] sm:$0xff] %v463_v18  ;;  %466 = vst [vmem:[%s2743_s1 + $0x698] sm:$0xff] %v465_v19  ;;  %v469_v21 = vld [vmem:[%s2742_s0 + $0x6a8] sm:$0xff]  ;;  %v471_v22 = vld [vmem:[%s2742_s0 + $0x6b0] sm:$0xff] }
  0x6c   :  { %468 = vst [vmem:[%s2743_s1 + $0x6a0] sm:$0xff] %v467_v20  ;;  %v473_v23 = vld [vmem:[%s2742_s0 + $0x6b8] sm:$0xff]  ;;  %470 = vst [vmem:[%s2743_s1 + $0x6a8] sm:$0xff] %v469_v21  ;;  %v475_v24 = vld [vmem:[%s2742_s0 + $0x6c0] sm:$0xff] }
  0x6d   :  { %472 = vst [vmem:[%s2743_s1 + $0x6b0] sm:$0xff] %v471_v22  ;;  %474 = vst [vmem:[%s2743_s1 + $0x6b8] sm:$0xff] %v473_v23  ;;  %v477_v25 = vld [vmem:[%s2742_s0 + $0x6c8] sm:$0xff]  ;;  %v479_v26 = vld [vmem:[%s2742_s0 + $0x6d0] sm:$0xff] }
  0x6e   :  { %476 = vst [vmem:[%s2743_s1 + $0x6c0] sm:$0xff] %v475_v24  ;;  %478 = vst [vmem:[%s2743_s1 + $0x6c8] sm:$0xff] %v477_v25  ;;  %v481_v27 = vld [vmem:[%s2742_s0 + $0x6d8] sm:$0xff]  ;;  %v483_v28 = vld [vmem:[%s2742_s0 + $0x6e0] sm:$0xff] }
  0x6f   :  { %480 = vst [vmem:[%s2743_s1 + $0x6d0] sm:$0xff] %v479_v26  ;;  %v485_v29 = vld [vmem:[%s2742_s0 + $0x6e8] sm:$0xff]  ;;  %482 = vst [vmem:[%s2743_s1 + $0x6d8] sm:$0xff] %v481_v27  ;;  %v487_v30 = vld [vmem:[%s2742_s0 + $0x6f0] sm:$0xff] }
  0x70   :  { %484 = vst [vmem:[%s2743_s1 + $0x6e0] sm:$0xff] %v483_v28  ;;  %486 = vst [vmem:[%s2743_s1 + $0x6e8] sm:$0xff] %v485_v29  ;;  %v489_v31 = vld [vmem:[%s2742_s0 + $0x6f8] sm:$0xff]  ;;  %v491_v32 = vld [vmem:[%s2742_s0 + $0x700] sm:$0xff] }
  0x71   :  { %488 = vst [vmem:[%s2743_s1 + $0x6f0] sm:$0xff] %v487_v30  ;;  %490 = vst [vmem:[%s2743_s1 + $0x6f8] sm:$0xff] %v489_v31  ;;  %v493_v33 = vld [vmem:[%s2742_s0 + $0x708] sm:$0xff]  ;;  %v495_v34 = vld [vmem:[%s2742_s0 + $0x710] sm:$0xff] }
  0x72   :  { %492 = vst [vmem:[%s2743_s1 + $0x700] sm:$0xff] %v491_v32  ;;  %v497_v35 = vld [vmem:[%s2742_s0 + $0x718] sm:$0xff]  ;;  %494 = vst [vmem:[%s2743_s1 + $0x708] sm:$0xff] %v493_v33  ;;  %v499_v36 = vld [vmem:[%s2742_s0 + $0x720] sm:$0xff] }
  0x73   :  { %496 = vst [vmem:[%s2743_s1 + $0x710] sm:$0xff] %v495_v34  ;;  %498 = vst [vmem:[%s2743_s1 + $0x718] sm:$0xff] %v497_v35  ;;  %v501_v37 = vld [vmem:[%s2742_s0 + $0x728] sm:$0xff]  ;;  %v503_v38 = vld [vmem:[%s2742_s0 + $0x730] sm:$0xff] }
  0x74   :  { %500 = vst [vmem:[%s2743_s1 + $0x720] sm:$0xff] %v499_v36  ;;  %502 = vst [vmem:[%s2743_s1 + $0x728] sm:$0xff] %v501_v37  ;;  %v505_v39 = vld [vmem:[%s2742_s0 + $0x738] sm:$0xff]  ;;  %v507_v40 = vld [vmem:[%s2742_s0 + $0x740] sm:$0xff] }
  0x75   :  { %504 = vst [vmem:[%s2743_s1 + $0x730] sm:$0xff] %v503_v38  ;;  %v509_v41 = vld [vmem:[%s2742_s0 + $0x748] sm:$0xff]  ;;  %506 = vst [vmem:[%s2743_s1 + $0x738] sm:$0xff] %v505_v39  ;;  %v511_v42 = vld [vmem:[%s2742_s0 + $0x750] sm:$0xff] }
  0x76   :  { %508 = vst [vmem:[%s2743_s1 + $0x740] sm:$0xff] %v507_v40  ;;  %510 = vst [vmem:[%s2743_s1 + $0x748] sm:$0xff] %v509_v41  ;;  %v513_v43 = vld [vmem:[%s2742_s0 + $0x758] sm:$0xff]  ;;  %v515_v44 = vld [vmem:[%s2742_s0 + $0x760] sm:$0xff] }
  0x77   :  { %512 = vst [vmem:[%s2743_s1 + $0x750] sm:$0xff] %v511_v42  ;;  %514 = vst [vmem:[%s2743_s1 + $0x758] sm:$0xff] %v513_v43  ;;  %v517_v45 = vld [vmem:[%s2742_s0 + $0x768] sm:$0xff]  ;;  %v519_v46 = vld [vmem:[%s2742_s0 + $0x770] sm:$0xff] }
  0x78   :  { %516 = vst [vmem:[%s2743_s1 + $0x760] sm:$0xff] %v515_v44  ;;  %v521_v47 = vld [vmem:[%s2742_s0 + $0x778] sm:$0xff]  ;;  %518 = vst [vmem:[%s2743_s1 + $0x768] sm:$0xff] %v517_v45  ;;  %v523_v48 = vld [vmem:[%s2742_s0 + $0x780] sm:$0xff] }
  0x79   :  { %520 = vst [vmem:[%s2743_s1 + $0x770] sm:$0xff] %v519_v46  ;;  %522 = vst [vmem:[%s2743_s1 + $0x778] sm:$0xff] %v521_v47  ;;  %v525_v49 = vld [vmem:[%s2742_s0 + $0x788] sm:$0xff]  ;;  %v527_v50 = vld [vmem:[%s2742_s0 + $0x790] sm:$0xff] }
  0x7a   :  { %524 = vst [vmem:[%s2743_s1 + $0x780] sm:$0xff] %v523_v48  ;;  %526 = vst [vmem:[%s2743_s1 + $0x788] sm:$0xff] %v525_v49  ;;  %v529_v51 = vld [vmem:[%s2742_s0 + $0x798] sm:$0xff]  ;;  %v531_v52 = vld [vmem:[%s2742_s0 + $0x7a0] sm:$0xff] }
  0x7b   :  { %528 = vst [vmem:[%s2743_s1 + $0x790] sm:$0xff] %v527_v50  ;;  %v533_v53 = vld [vmem:[%s2742_s0 + $0x7a8] sm:$0xff]  ;;  %530 = vst [vmem:[%s2743_s1 + $0x798] sm:$0xff] %v529_v51  ;;  %v535_v54 = vld [vmem:[%s2742_s0 + $0x7b0] sm:$0xff] }
  0x7c   :  { %532 = vst [vmem:[%s2743_s1 + $0x7a0] sm:$0xff] %v531_v52  ;;  %534 = vst [vmem:[%s2743_s1 + $0x7a8] sm:$0xff] %v533_v53  ;;  %v537_v55 = vld [vmem:[%s2742_s0 + $0x7b8] sm:$0xff]  ;;  %v539_v56 = vld [vmem:[%s2742_s0 + $0x7c0] sm:$0xff] }
  0x7d   :  { %536 = vst [vmem:[%s2743_s1 + $0x7b0] sm:$0xff] %v535_v54  ;;  %538 = vst [vmem:[%s2743_s1 + $0x7b8] sm:$0xff] %v537_v55  ;;  %v541_v57 = vld [vmem:[%s2742_s0 + $0x7c8] sm:$0xff]  ;;  %v543_v58 = vld [vmem:[%s2742_s0 + $0x7d0] sm:$0xff] }
  0x7e   :  { %540 = vst [vmem:[%s2743_s1 + $0x7c0] sm:$0xff] %v539_v56  ;;  %v545_v59 = vld [vmem:[%s2742_s0 + $0x7d8] sm:$0xff]  ;;  %542 = vst [vmem:[%s2743_s1 + $0x7c8] sm:$0xff] %v541_v57  ;;  %v547_v60 = vld [vmem:[%s2742_s0 + $0x7e0] sm:$0xff] }
  0x7f   :  { %544 = vst [vmem:[%s2743_s1 + $0x7d0] sm:$0xff] %v543_v58  ;;  %546 = vst [vmem:[%s2743_s1 + $0x7d8] sm:$0xff] %v545_v59  ;;  %v549_v61 = vld [vmem:[%s2742_s0 + $0x7e8] sm:$0xff]  ;;  %v551_v62 = vld [vmem:[%s2742_s0 + $0x7f0] sm:$0xff] }
  0x80   :  { %548 = vst [vmem:[%s2743_s1 + $0x7e0] sm:$0xff] %v547_v60  ;;  %550 = vst [vmem:[%s2743_s1 + $0x7e8] sm:$0xff] %v549_v61  ;;  %v553_v63 = vld [vmem:[%s2742_s0 + $0x7f8] sm:$0xff]  ;;  %v555_v0 = vld [vmem:[%s2742_s0 + $0x800] sm:$0xff] }
  0x81   :  { %552 = vst [vmem:[%s2743_s1 + $0x7f0] sm:$0xff] %v551_v62  ;;  %v557_v1 = vld [vmem:[%s2742_s0 + $0x808] sm:$0xff]  ;;  %554 = vst [vmem:[%s2743_s1 + $0x7f8] sm:$0xff] %v553_v63  ;;  %v559_v2 = vld [vmem:[%s2742_s0 + $0x810] sm:$0xff] }
  0x82   :  { %556 = vst [vmem:[%s2743_s1 + $0x800] sm:$0xff] %v555_v0  ;;  %558 = vst [vmem:[%s2743_s1 + $0x808] sm:$0xff] %v557_v1  ;;  %v561_v3 = vld [vmem:[%s2742_s0 + $0x818] sm:$0xff]  ;;  %v563_v4 = vld [vmem:[%s2742_s0 + $0x820] sm:$0xff] }
  0x83   :  { %560 = vst [vmem:[%s2743_s1 + $0x810] sm:$0xff] %v559_v2  ;;  %562 = vst [vmem:[%s2743_s1 + $0x818] sm:$0xff] %v561_v3  ;;  %v565_v5 = vld [vmem:[%s2742_s0 + $0x828] sm:$0xff]  ;;  %v567_v6 = vld [vmem:[%s2742_s0 + $0x830] sm:$0xff] }
  0x84   :  { %564 = vst [vmem:[%s2743_s1 + $0x820] sm:$0xff] %v563_v4  ;;  %v569_v7 = vld [vmem:[%s2742_s0 + $0x838] sm:$0xff]  ;;  %566 = vst [vmem:[%s2743_s1 + $0x828] sm:$0xff] %v565_v5  ;;  %v571_v8 = vld [vmem:[%s2742_s0 + $0x840] sm:$0xff] }
  0x85   :  { %568 = vst [vmem:[%s2743_s1 + $0x830] sm:$0xff] %v567_v6  ;;  %570 = vst [vmem:[%s2743_s1 + $0x838] sm:$0xff] %v569_v7  ;;  %v573_v9 = vld [vmem:[%s2742_s0 + $0x848] sm:$0xff]  ;;  %v575_v10 = vld [vmem:[%s2742_s0 + $0x850] sm:$0xff] }
  0x86   :  { %572 = vst [vmem:[%s2743_s1 + $0x840] sm:$0xff] %v571_v8  ;;  %574 = vst [vmem:[%s2743_s1 + $0x848] sm:$0xff] %v573_v9  ;;  %v577_v11 = vld [vmem:[%s2742_s0 + $0x858] sm:$0xff]  ;;  %v579_v12 = vld [vmem:[%s2742_s0 + $0x860] sm:$0xff] }
  0x87   :  { %576 = vst [vmem:[%s2743_s1 + $0x850] sm:$0xff] %v575_v10  ;;  %v581_v13 = vld [vmem:[%s2742_s0 + $0x868] sm:$0xff]  ;;  %578 = vst [vmem:[%s2743_s1 + $0x858] sm:$0xff] %v577_v11  ;;  %v583_v14 = vld [vmem:[%s2742_s0 + $0x870] sm:$0xff] }
  0x88   :  { %580 = vst [vmem:[%s2743_s1 + $0x860] sm:$0xff] %v579_v12  ;;  %582 = vst [vmem:[%s2743_s1 + $0x868] sm:$0xff] %v581_v13  ;;  %v585_v15 = vld [vmem:[%s2742_s0 + $0x878] sm:$0xff]  ;;  %v587_v16 = vld [vmem:[%s2742_s0 + $0x880] sm:$0xff] }
  0x89   :  { %584 = vst [vmem:[%s2743_s1 + $0x870] sm:$0xff] %v583_v14  ;;  %586 = vst [vmem:[%s2743_s1 + $0x878] sm:$0xff] %v585_v15  ;;  %v589_v17 = vld [vmem:[%s2742_s0 + $0x888] sm:$0xff]  ;;  %v591_v18 = vld [vmem:[%s2742_s0 + $0x890] sm:$0xff] }
  0x8a   :  { %588 = vst [vmem:[%s2743_s1 + $0x880] sm:$0xff] %v587_v16  ;;  %v593_v19 = vld [vmem:[%s2742_s0 + $0x898] sm:$0xff]  ;;  %590 = vst [vmem:[%s2743_s1 + $0x888] sm:$0xff] %v589_v17  ;;  %v595_v20 = vld [vmem:[%s2742_s0 + $0x8a0] sm:$0xff] }
  0x8b   :  { %592 = vst [vmem:[%s2743_s1 + $0x890] sm:$0xff] %v591_v18  ;;  %594 = vst [vmem:[%s2743_s1 + $0x898] sm:$0xff] %v593_v19  ;;  %v597_v21 = vld [vmem:[%s2742_s0 + $0x8a8] sm:$0xff]  ;;  %v599_v22 = vld [vmem:[%s2742_s0 + $0x8b0] sm:$0xff] }
  0x8c   :  { %596 = vst [vmem:[%s2743_s1 + $0x8a0] sm:$0xff] %v595_v20  ;;  %598 = vst [vmem:[%s2743_s1 + $0x8a8] sm:$0xff] %v597_v21  ;;  %v601_v23 = vld [vmem:[%s2742_s0 + $0x8b8] sm:$0xff]  ;;  %v603_v24 = vld [vmem:[%s2742_s0 + $0x8c0] sm:$0xff] }
  0x8d   :  { %600 = vst [vmem:[%s2743_s1 + $0x8b0] sm:$0xff] %v599_v22  ;;  %v605_v25 = vld [vmem:[%s2742_s0 + $0x8c8] sm:$0xff]  ;;  %602 = vst [vmem:[%s2743_s1 + $0x8b8] sm:$0xff] %v601_v23  ;;  %v607_v26 = vld [vmem:[%s2742_s0 + $0x8d0] sm:$0xff] }
  0x8e   :  { %604 = vst [vmem:[%s2743_s1 + $0x8c0] sm:$0xff] %v603_v24  ;;  %606 = vst [vmem:[%s2743_s1 + $0x8c8] sm:$0xff] %v605_v25  ;;  %v609_v27 = vld [vmem:[%s2742_s0 + $0x8d8] sm:$0xff]  ;;  %v611_v28 = vld [vmem:[%s2742_s0 + $0x8e0] sm:$0xff] }
  0x8f   :  { %608 = vst [vmem:[%s2743_s1 + $0x8d0] sm:$0xff] %v607_v26  ;;  %610 = vst [vmem:[%s2743_s1 + $0x8d8] sm:$0xff] %v609_v27  ;;  %v613_v29 = vld [vmem:[%s2742_s0 + $0x8e8] sm:$0xff]  ;;  %v615_v30 = vld [vmem:[%s2742_s0 + $0x8f0] sm:$0xff] }
  0x90   :  { %612 = vst [vmem:[%s2743_s1 + $0x8e0] sm:$0xff] %v611_v28  ;;  %v617_v31 = vld [vmem:[%s2742_s0 + $0x8f8] sm:$0xff]  ;;  %614 = vst [vmem:[%s2743_s1 + $0x8e8] sm:$0xff] %v613_v29  ;;  %v619_v32 = vld [vmem:[%s2742_s0 + $0x900] sm:$0xff] }
  0x91   :  { %616 = vst [vmem:[%s2743_s1 + $0x8f0] sm:$0xff] %v615_v30  ;;  %618 = vst [vmem:[%s2743_s1 + $0x8f8] sm:$0xff] %v617_v31  ;;  %v621_v33 = vld [vmem:[%s2742_s0 + $0x908] sm:$0xff]  ;;  %v623_v34 = vld [vmem:[%s2742_s0 + $0x910] sm:$0xff] }
  0x92   :  { %620 = vst [vmem:[%s2743_s1 + $0x900] sm:$0xff] %v619_v32  ;;  %622 = vst [vmem:[%s2743_s1 + $0x908] sm:$0xff] %v621_v33  ;;  %v625_v35 = vld [vmem:[%s2742_s0 + $0x918] sm:$0xff]  ;;  %v627_v36 = vld [vmem:[%s2742_s0 + $0x920] sm:$0xff] }
  0x93   :  { %624 = vst [vmem:[%s2743_s1 + $0x910] sm:$0xff] %v623_v34  ;;  %v629_v37 = vld [vmem:[%s2742_s0 + $0x928] sm:$0xff]  ;;  %626 = vst [vmem:[%s2743_s1 + $0x918] sm:$0xff] %v625_v35  ;;  %v631_v38 = vld [vmem:[%s2742_s0 + $0x930] sm:$0xff] }
  0x94   :  { %628 = vst [vmem:[%s2743_s1 + $0x920] sm:$0xff] %v627_v36  ;;  %630 = vst [vmem:[%s2743_s1 + $0x928] sm:$0xff] %v629_v37  ;;  %v633_v39 = vld [vmem:[%s2742_s0 + $0x938] sm:$0xff]  ;;  %v635_v40 = vld [vmem:[%s2742_s0 + $0x940] sm:$0xff] }
  0x95   :  { %632 = vst [vmem:[%s2743_s1 + $0x930] sm:$0xff] %v631_v38  ;;  %634 = vst [vmem:[%s2743_s1 + $0x938] sm:$0xff] %v633_v39  ;;  %v637_v41 = vld [vmem:[%s2742_s0 + $0x948] sm:$0xff]  ;;  %v639_v42 = vld [vmem:[%s2742_s0 + $0x950] sm:$0xff] }
  0x96   :  { %636 = vst [vmem:[%s2743_s1 + $0x940] sm:$0xff] %v635_v40  ;;  %v641_v43 = vld [vmem:[%s2742_s0 + $0x958] sm:$0xff]  ;;  %638 = vst [vmem:[%s2743_s1 + $0x948] sm:$0xff] %v637_v41  ;;  %v643_v44 = vld [vmem:[%s2742_s0 + $0x960] sm:$0xff] }
  0x97   :  { %640 = vst [vmem:[%s2743_s1 + $0x950] sm:$0xff] %v639_v42  ;;  %642 = vst [vmem:[%s2743_s1 + $0x958] sm:$0xff] %v641_v43  ;;  %v645_v45 = vld [vmem:[%s2742_s0 + $0x968] sm:$0xff]  ;;  %v647_v46 = vld [vmem:[%s2742_s0 + $0x970] sm:$0xff] }
  0x98   :  { %644 = vst [vmem:[%s2743_s1 + $0x960] sm:$0xff] %v643_v44  ;;  %646 = vst [vmem:[%s2743_s1 + $0x968] sm:$0xff] %v645_v45  ;;  %v649_v47 = vld [vmem:[%s2742_s0 + $0x978] sm:$0xff]  ;;  %v651_v48 = vld [vmem:[%s2742_s0 + $0x980] sm:$0xff] }
  0x99   :  { %648 = vst [vmem:[%s2743_s1 + $0x970] sm:$0xff] %v647_v46  ;;  %v653_v49 = vld [vmem:[%s2742_s0 + $0x988] sm:$0xff]  ;;  %650 = vst [vmem:[%s2743_s1 + $0x978] sm:$0xff] %v649_v47  ;;  %v655_v50 = vld [vmem:[%s2742_s0 + $0x990] sm:$0xff] }
  0x9a   :  { %652 = vst [vmem:[%s2743_s1 + $0x980] sm:$0xff] %v651_v48  ;;  %654 = vst [vmem:[%s2743_s1 + $0x988] sm:$0xff] %v653_v49  ;;  %v657_v51 = vld [vmem:[%s2742_s0 + $0x998] sm:$0xff]  ;;  %v659_v52 = vld [vmem:[%s2742_s0 + $0x9a0] sm:$0xff] }
  0x9b   :  { %656 = vst [vmem:[%s2743_s1 + $0x990] sm:$0xff] %v655_v50  ;;  %658 = vst [vmem:[%s2743_s1 + $0x998] sm:$0xff] %v657_v51  ;;  %v661_v53 = vld [vmem:[%s2742_s0 + $0x9a8] sm:$0xff]  ;;  %v663_v54 = vld [vmem:[%s2742_s0 + $0x9b0] sm:$0xff] }
  0x9c   :  { %660 = vst [vmem:[%s2743_s1 + $0x9a0] sm:$0xff] %v659_v52  ;;  %v665_v55 = vld [vmem:[%s2742_s0 + $0x9b8] sm:$0xff]  ;;  %662 = vst [vmem:[%s2743_s1 + $0x9a8] sm:$0xff] %v661_v53  ;;  %v667_v56 = vld [vmem:[%s2742_s0 + $0x9c0] sm:$0xff] }
  0x9d   :  { %664 = vst [vmem:[%s2743_s1 + $0x9b0] sm:$0xff] %v663_v54  ;;  %666 = vst [vmem:[%s2743_s1 + $0x9b8] sm:$0xff] %v665_v55  ;;  %v669_v57 = vld [vmem:[%s2742_s0 + $0x9c8] sm:$0xff]  ;;  %v671_v58 = vld [vmem:[%s2742_s0 + $0x9d0] sm:$0xff] }
  0x9e   :  { %668 = vst [vmem:[%s2743_s1 + $0x9c0] sm:$0xff] %v667_v56  ;;  %670 = vst [vmem:[%s2743_s1 + $0x9c8] sm:$0xff] %v669_v57  ;;  %v673_v59 = vld [vmem:[%s2742_s0 + $0x9d8] sm:$0xff]  ;;  %v675_v60 = vld [vmem:[%s2742_s0 + $0x9e0] sm:$0xff] }
  0x9f   :  { %672 = vst [vmem:[%s2743_s1 + $0x9d0] sm:$0xff] %v671_v58  ;;  %v677_v61 = vld [vmem:[%s2742_s0 + $0x9e8] sm:$0xff]  ;;  %674 = vst [vmem:[%s2743_s1 + $0x9d8] sm:$0xff] %v673_v59  ;;  %v679_v62 = vld [vmem:[%s2742_s0 + $0x9f0] sm:$0xff] }
  0xa0   :  { %676 = vst [vmem:[%s2743_s1 + $0x9e0] sm:$0xff] %v675_v60  ;;  %678 = vst [vmem:[%s2743_s1 + $0x9e8] sm:$0xff] %v677_v61  ;;  %v681_v63 = vld [vmem:[%s2742_s0 + $0x9f8] sm:$0xff]  ;;  %v683_v0 = vld [vmem:[%s2742_s0 + $0xa00] sm:$0xff] }
  0xa1   :  { %680 = vst [vmem:[%s2743_s1 + $0x9f0] sm:$0xff] %v679_v62  ;;  %682 = vst [vmem:[%s2743_s1 + $0x9f8] sm:$0xff] %v681_v63  ;;  %v685_v1 = vld [vmem:[%s2742_s0 + $0xa08] sm:$0xff]  ;;  %v687_v2 = vld [vmem:[%s2742_s0 + $0xa10] sm:$0xff] }
  0xa2   :  { %684 = vst [vmem:[%s2743_s1 + $0xa00] sm:$0xff] %v683_v0  ;;  %v689_v3 = vld [vmem:[%s2742_s0 + $0xa18] sm:$0xff]  ;;  %686 = vst [vmem:[%s2743_s1 + $0xa08] sm:$0xff] %v685_v1  ;;  %v691_v4 = vld [vmem:[%s2742_s0 + $0xa20] sm:$0xff] }
  0xa3   :  { %688 = vst [vmem:[%s2743_s1 + $0xa10] sm:$0xff] %v687_v2  ;;  %690 = vst [vmem:[%s2743_s1 + $0xa18] sm:$0xff] %v689_v3  ;;  %v693_v5 = vld [vmem:[%s2742_s0 + $0xa28] sm:$0xff]  ;;  %v695_v6 = vld [vmem:[%s2742_s0 + $0xa30] sm:$0xff] }
  0xa4   :  { %692 = vst [vmem:[%s2743_s1 + $0xa20] sm:$0xff] %v691_v4  ;;  %694 = vst [vmem:[%s2743_s1 + $0xa28] sm:$0xff] %v693_v5  ;;  %v697_v7 = vld [vmem:[%s2742_s0 + $0xa38] sm:$0xff]  ;;  %v699_v8 = vld [vmem:[%s2742_s0 + $0xa40] sm:$0xff] }
  0xa5   :  { %696 = vst [vmem:[%s2743_s1 + $0xa30] sm:$0xff] %v695_v6  ;;  %v701_v9 = vld [vmem:[%s2742_s0 + $0xa48] sm:$0xff]  ;;  %698 = vst [vmem:[%s2743_s1 + $0xa38] sm:$0xff] %v697_v7  ;;  %v741_v10 = vld [vmem:[%s2742_s0 + $0xa50] sm:$0x1f] }
  0xa6   :  { %700 = vst [vmem:[%s2743_s1 + $0xa40] sm:$0xff] %v699_v8  ;;  %702 = vst [vmem:[%s2743_s1 + $0xa48] sm:$0xff] %v701_v9 }
  0xa7   :  { %742 = vst [vmem:[%s2743_s1 + $0xa50] sm:$0x1f] %v741_v10 }
  0xa8   :  { %717 = vsyncadd [#allocation2], 42320 }
  0xa9   :  { %744 = dma.done.wait [#allocation2], 42320 }
  0xaa   :  { %745 = vsyncadd [#allocation2], 4294924976 }
  0xab   :  { %721 = vsyncmov [#allocation2] }
  0xae   :  { %s722_s25 = vpop.sfrf %721 }
  0xaf   :  { %p743_p0 = scmp.ne.s32.totalorder %s722_s25, 0 }
  0xb1   :  { %726 = shalt.err (%p743_p0)  }

</bundles_post_ra>
